<compile_context>
chip_gen: v7x
topology: tpu7x:2x2x1
jax: 0.10.0
libtpu: 0.0.40
codegen_flags: <defaults>
</compile_context>

<pallas_src>
import jax
import jax.numpy as jnp
from jax.experimental import pallas as pl
from jax.experimental.pallas import tpu as pltpu


def _round_up(n, m):
    return ((n + m - 1) // m) * m


def _cdiv(a, b):
    return -(-a // b)


def fm_kernel(b_ref, x_ref, rhs_ref, s_ref, out_ref):
    """One batch tile of the FM forward pass.

    b_ref:   (1, 1)   f32 SMEM  -- linear bias (scalar)
    x_ref:   (TB, F)  VMEM      -- batch tile of features
    rhs_ref: (F, K+1) VMEM      -- [v | w] fused matmul RHS
    s_ref:   (F, 1)   VMEM      -- sum_k v[:, k]^2
    out_ref: (TB, 1)  VMEM      -- sigmoid(FM(x))
    """
    x = x_ref[...]                                   # (TB, F)
    rhs = rhs_ref[...]                               # (F, K+1)
    s = s_ref[...]                                   # (F, 1)
    bias = b_ref[0, 0]

    kp1 = rhs.shape[1]                               # K + 1 (static)

    # Single MXU pass for both terms: columns [0, K) = x @ v, column K = x @ w.
    xr = jnp.dot(x, rhs, preferred_element_type=jnp.float32)      # (TB, K+1)
    xv = xr[:, : kp1 - 1]                                          # (TB, K)
    linear = xr[:, kp1 - 1 : kp1]                                  # (TB, 1)

    # part2 = sum_k (x^2 @ v^2)_k == (x*x) @ sum_k v^2  (one narrow MXU pass,
    # no (TB, K) intermediate and no second cross-lane reduction).
    x2s = jnp.dot(x * x, s, preferred_element_type=jnp.float32)    # (TB, 1)

    part1 = jnp.sum(xv * xv, axis=1, keepdims=True)                # (TB, 1)
    z = linear + bias + 0.5 * (part1 - x2s)
    out_ref[...] = jax.nn.sigmoid(z).astype(out_ref.dtype)


def fm_forward(x, w, b, v, *, tile_b=None):
    """sigmoid(x @ w + b + 0.5 * (sum((x@v)^2, 1) - sum(x^2 @ v^2, 1))) -> (B,)."""
    B, F = x.shape
    K = v.shape[1]

    if tile_b is None:
        # Rows per tile such that the double-buffered f32 x tile is ~<=8 MiB,
        # capped at 2048 (>=85% of HBM roofline per measured tile sweeps).
        budget_rows = (8 * 1024 * 1024) // (2 * F * 4)
        cap = max(128, min(2048, (budget_rows // 128) * 128))
        if B <= cap:
            # Single tile: only pad to the sublane multiple (8), not 128.
            tile_b = _round_up(B, 8)
        else:
            n_tiles = _cdiv(B, cap)
            tile_b = _round_up(_cdiv(B, n_tiles), 128)

    b_pad = _round_up(B, tile_b)
    xp = x.astype(jnp.float32)
    if b_pad != B:
        xp = jnp.pad(xp, ((0, b_pad - B), (0, 0)))   # zero rows -> sliced off below

    # One-time parameter prep in the wrapper (hoisted out of the per-tile loop).
    rhs = jnp.concatenate([v, w], axis=1).astype(jnp.float32)             # (F, K+1)
    s = jnp.sum(jnp.square(v), axis=1, keepdims=True).astype(jnp.float32)  # (F, 1)
    b_sc = jnp.reshape(b, (1, 1)).astype(jnp.float32)                      # (1, 1)

    grid = (b_pad // tile_b,)
    cost = pl.CostEstimate(
        flops=2 * b_pad * F * (K + 2) + 8 * b_pad * (K + 2),
        transcendentals=b_pad,
        bytes_accessed=4 * (b_pad * F + b_pad + F * (K + 2) + 1),
    )

    out = pl.pallas_call(
        fm_kernel,
        out_shape=jax.ShapeDtypeStruct((b_pad, 1), jnp.float32),
        grid=grid,
        in_specs=[
            pl.BlockSpec((1, 1), lambda i: (0, 0),
                         memory_space=pltpu.MemorySpace.SMEM),   # bias scalar
            pl.BlockSpec((tile_b, F), lambda i: (i, 0)),         # x batch tile
            pl.BlockSpec((F, K + 1), lambda i: (0, 0)),          # [v | w]
            pl.BlockSpec((F, 1), lambda i: (0, 0)),              # sum_k v^2
        ],
        out_specs=pl.BlockSpec((tile_b, 1), lambda i: (i, 0)),
        compiler_params=pltpu.CompilerParams(
            dimension_semantics=("parallel",)),
        cost_estimate=cost,
    )(b_sc, xp, rhs, s)

    # Matches torch `.squeeze()` for B > 1 (torch would give a 0-d scalar at B==1).
    return out[:B, 0]


def fm_reference(x, w, b, v):
    linear_part = (x @ w)[:, 0] + jnp.reshape(b, ())
    part1 = jnp.sum(jnp.square(x @ v), axis=1)
    part2 = jnp.sum(jnp.square(x) @ jnp.square(v), axis=1)
    interaction = 0.5 * (part1 - part2)
    return jax.nn.sigmoid(linear_part + interaction)


if __name__ == "__main__":
    # Small shapes consistent with the module: batch=8, feature_size=32, k=8
    B, F, K = 8, 32, 8
    key = jax.random.PRNGKey(0)
    kx, kw, kb, kv = jax.random.split(key, 4)

    x = jax.random.normal(kx, (B, F), dtype=jnp.float32)

    # Parameter shapes from FM.__init__:
    #   nn.Linear(feature_size, 1): weight (1, F) -> stored here as (F, 1), bias (1,)
    #   v: normal(0, 0.01), shape (F, K)
    bound = 1.0 / jnp.sqrt(jnp.float32(F))
    w = jax.random.uniform(kw, (F, 1), jnp.float32, -bound, bound)
    b = jax.random.uniform(kb, (1, 1), jnp.float32, -bound, bound)
    v = 0.01 * jax.random.normal(kv, (F, K), dtype=jnp.float32)

    out = jax.block_until_ready(fm_forward(x, w, b, v))

    ref = fm_reference(x, w, b, v)
    assert out.shape == (B,)
    assert jnp.allclose(out, ref, atol=1e-5, rtol=1e-5), (out, ref)

    print("KERNEL_OK")
</pallas_src>

<mosaic_0001>
module attributes {stable_mosaic.version = 11 : i64} {
  func.func @fm_kernel(%arg0: i32, %arg1: memref<1x1xf32, #tpu.memory_space<smem>>, %arg2: memref<8x32xf32, #tpu.memory_space<vmem>>, %arg3: memref<32x9xf32, #tpu.memory_space<vmem>>, %arg4: memref<32x1xf32, #tpu.memory_space<vmem>>, %arg5: memref<8x1xf32, #tpu.memory_space<vmem>>) attributes {dimension_semantics = [#tpu.dimension_semantics<parallel>], iteration_bounds = array<i64: 1>, scalar_prefetch = 0 : i64, scratch_operands = 0 : i64, tpu.core_type = #tpu.core_type<tc>, window_params = [{transform_indices = @transform_0, window_bounds = array<i64: 1, 1>}, {transform_indices = @transform_1, window_bounds = array<i64: 8, 32>}, {pipeline_mode = #tpu.pipeline_mode<synchronous>, transform_indices = @transform_2, window_bounds = array<i64: 32, 9>}, {pipeline_mode = #tpu.pipeline_mode<synchronous>, transform_indices = @transform_3, window_bounds = array<i64: 32, 1>}, {transform_indices = @transform_4, window_bounds = array<i64: 8, 1>}]} {
    %c0 = arith.constant 0 : index
    %c0_0 = arith.constant 0 : index
    %0 = vector.load %arg2[%c0, %c0_0] : memref<8x32xf32, #tpu.memory_space<vmem>>, vector<8x32xf32>
    %c0_1 = arith.constant 0 : index
    %c0_2 = arith.constant 0 : index
    %1 = vector.load %arg3[%c0_1, %c0_2] : memref<32x9xf32, #tpu.memory_space<vmem>>, vector<32x9xf32>
    %c0_3 = arith.constant 0 : index
    %c0_4 = arith.constant 0 : index
    %2 = vector.load %arg4[%c0_3, %c0_4] : memref<32x1xf32, #tpu.memory_space<vmem>>, vector<32x1xf32>
    %c0_5 = arith.constant 0 : index
    %c0_6 = arith.constant 0 : index
    %3 = memref.load %arg1[%c0_5, %c0_6] : memref<1x1xf32, #tpu.memory_space<smem>>
    %cst = arith.constant dense<0.000000e+00> : vector<8x9xf32>
    %4 = tpu.matmul %0, %1, %cst {dimension_numbers = #tpu.dot_dimension_numbers<[1], [0], [0], [1], [0, 0, 1, 1], [], []>} : vector<8x32xf32>, vector<32x9xf32>, vector<8x9xf32> -> vector<8x9xf32>
    %5 = vector.extract_strided_slice %4 {offsets = [0, 0], sizes = [8, 8], strides = [1, 1]} : vector<8x9xf32> to vector<8x8xf32>
    %6 = vector.extract_strided_slice %4 {offsets = [0, 8], sizes = [8, 1], strides = [1, 1]} : vector<8x9xf32> to vector<8x1xf32>
    %7 = arith.mulf %0, %0 : vector<8x32xf32>
    %cst_7 = arith.constant dense<0.000000e+00> : vector<8x1xf32>
    %8 = tpu.matmul %7, %2, %cst_7 {dimension_numbers = #tpu.dot_dimension_numbers<[1], [0], [0], [1], [0, 0, 1, 1], [], []>} : vector<8x32xf32>, vector<32x1xf32>, vector<8x1xf32> -> vector<8x1xf32>
    %9 = arith.mulf %5, %5 : vector<8x8xf32>
    %cst_8 = arith.constant dense<0.000000e+00> : vector<8xf32>
    %10 = vector.multi_reduction <add>, %9, %cst_8 [1] : vector<8x8xf32> to vector<8xf32>
    %11 = vector.shape_cast %10 : vector<8xf32> to vector<8x1xf32>
    %12 = vector.broadcast %3 : f32 to vector<8x1xf32>
    %13 = arith.addf %6, %12 : vector<8x1xf32>
    %14 = arith.subf %11, %8 : vector<8x1xf32>
    %cst_9 = arith.constant 5.000000e-01 : f32
    %15 = vector.broadcast %cst_9 : f32 to vector<8x1xf32>
    %16 = arith.mulf %15, %14 : vector<8x1xf32>
    %17 = arith.addf %13, %16 : vector<8x1xf32>
    %18 = arith.negf %17 : vector<8x1xf32>
    %19 = math.exp %18 : vector<8x1xf32>
    %cst_10 = arith.constant 1.000000e+00 : f32
    %20 = vector.broadcast %cst_10 : f32 to vector<8x1xf32>
    %21 = arith.addf %20, %19 : vector<8x1xf32>
    %22 = arith.divf %20, %21 : vector<8x1xf32>
    %c0_11 = arith.constant 0 : index
    %c0_12 = arith.constant 0 : index
    %23 = vector.load %arg5[%c0_11, %c0_12] : memref<8x1xf32, #tpu.memory_space<vmem>>, vector<8x1xf32>
    tpu.vector_store %arg5[%c0_11, %c0_12], %22 {strides = array<i32>} : memref<8x1xf32, #tpu.memory_space<vmem>>, vector<8x1xf32>,
    return
  }
  func.func @transform_0(%arg0: i32) -> (i32, i32) {
    %c0_i32 = arith.constant 0 : i32
    %c0_i32_0 = arith.constant 0 : i32
    %c0_i32_1 = arith.constant 0 : i32
    return %c0_i32, %c0_i32_0 : i32, i32
  }
  func.func @transform_1(%arg0: i32) -> (i32, i32) {
    %c0_i32 = arith.constant 0 : i32
    %c0_i32_0 = arith.constant 0 : i32
    return %arg0, %c0_i32 : i32, i32
  }
  func.func @transform_2(%arg0: i32) -> (i32, i32) {
    %c0_i32 = arith.constant 0 : i32
    %c0_i32_0 = arith.constant 0 : i32
    %c0_i32_1 = arith.constant 0 : i32
    return %c0_i32, %c0_i32_0 : i32, i32
  }
  func.func @transform_3(%arg0: i32) -> (i32, i32) {
    %c0_i32 = arith.constant 0 : i32
    %c0_i32_0 = arith.constant 0 : i32
    %c0_i32_1 = arith.constant 0 : i32
    return %c0_i32, %c0_i32_0 : i32, i32
  }
  func.func @transform_4(%arg0: i32) -> (i32, i32) {
    %c0_i32 = arith.constant 0 : i32
    %c0_i32_0 = arith.constant 0 : i32
    return %arg0, %c0_i32 : i32, i32
  }
}

</mosaic_0001>

<bundles_post_ra>
// kernel: tpu_custom_call.1
= control target key start
LH: loop header
LB: loop body
LE: loop exit
PB: predicated region body
PF: predicated region fallthrough
CT: control target
= control target key end

     0   :  { %v262_v0 = vmov 0.0|0.0   ;;  %vm263_vm0 = vmmov 0   ;;  %v264_v4 = vmov 0.0   ;;  %vm28_vm1 = vcmask 261120   ;;  %s266_s7 = smov 120   ;;  %s325_s2 = inlined_call_operand.vmem [shape: f32[32,9], index: 2, kind: input, shape index: {}]   ;;  %s326_s3 = inlined_call_operand.vmem [shape: f32[32,1], index: 3, kind: input, shape index: {}]   ;;  %s327_s1 = inlined_call_operand.vmem [shape: f32[8,32], index: 1, kind: input, shape index: {}]   ;;  %s328_s0 = inlined_call_operand.<no memory space> [shape: f32[1,1], index: 0, kind: input, shape index: {}]   ;;  %s329_s4 = inlined_call_operand.vmem [shape: f32[8,1], index: 4, kind: output, shape index: {}]  }
   0x1   :  { %241 = vmatprep.subr.bf16.mxu0 %v262_v0  ;;  %v19_v1 = vld [vmem:[%s325_s2] sm:$0xff]  ;;  %v20_v2 = vld [vmem:[%s325_s2 + $0x8] sm:$0xff]  ;;  %v21_v3 = vld [vmem:[%s325_s2 + $0x10] sm:$0xff]  ;;  %227 = vmatprep.mubr.msk.f32.mxu0 %vm263_vm0, %v264_v4  ;;  %vm177_vm2 = vcmask 64512   ;;  %v181_v25 = vstv %s328_s0  ;;  %vm200_vm3 = vcmask 7168  }
   0x2   :  { %v242_v5 = vpack.c.bf16 %v20_v2, %v19_v1  ;;  %v22_v6 = vld [vmem:[%s325_s2 + $0x18] sm:$0xff]  ;;  %247 = vmatprep.subr.bf16.mxu1 %v262_v0  ;;  %v23_v7 = vld [vmem:[%s326_s3] sm:$0xff]  ;;  %238 = vmatprep.mubr.msk.f32.mxu1 %vm263_vm0, %v264_v4  ;;  %v24_v8 = vld [vmem:[%s326_s3 + $0x8] sm:$0xff] }
   0x3   :  { %v25_v9 = vld [vmem:[%s326_s3 + $0x10] sm:$0xff]  ;;  %v26_v10 = vld [vmem:[%s326_s3 + $0x18] sm:$0xff]  ;;  %v245_v11 = vpack.c.bf16 %v22_v6, %v21_v3  ;;  %v248_v12 = vpack.c.bf16 %v24_v8, %v23_v7  ;;  %v18_v14 = vld [vmem:[%s327_s1] sm:$0xff]  ;;  %s265_s3 = smov 8  }
   0x4   :  { %243 = vmatpush3.bf16.msra.mxu0 %v242_v5  ;;  %v251_v13 = vpack.c.bf16 %v26_v10, %v25_v9  ;;  %v102_v15 = vmul.f32 %v18_v14, %v18_v14 }
   0x5   :  { %244 = vmatprep.subr.bf16.mxu0 %v262_v0  ;;  %249 = vmatpush3.bf16.msra.mxu1 %v248_v12 }
   0x6   :  { %250 = vmatprep.subr.bf16.mxu1 %v262_v0 }
   0x8   :  { %246 = vmatpush3.bf16.msra.mxu0 %v245_v11 }
   0x9   :  { %252 = vmatpush3.bf16.msra.mxu1 %v251_v13 }
   0xb   :  { %228 = vmatmul.mubr.msk.f32.vlgmr.msra.gmra.mrb[0].mxu0 %vm28_vm1, %v18_v14 }
   0xc   :  { %239 = vmatmul.mubr.msk.f32.vlgmr.msra.gmra.mrb[0].mxu1 %vm28_vm1, %v102_v15 }
  0xde   :  { %v98_v16 = vpop.f32.mrb[0].mxu0 }
  0xdf   :  { %v229_v17 = vpop.f32.mrb[1].mxu0  ;;  %v176_v18 = vmul.f32 %v98_v16, %v98_v16  ;;  %v172_v19 = vpop.f32.mrb[0].mxu1  ;;  %v182_v26 = vadd.f32 %v181_v25, %v98_v16 }
  0xe0   :  { %v240_v21 = vpop.f32.mrb[1].mxu1 }
  0xe1   :  { %v178_v20 = vsel %vm177_vm2, %v176_v18, 0.0 }
  0xe2   :  { %179 = vadd.xlane.f32.xlu0 %v178_v20 }
 0x16f   :  { %v180_v22 = vpop.xlane.xlu0 %179 }
 0x170   :  { %v183_v23 = vsub.f32 %v180_v22, %v172_v19 }
 0x172   :  { %v184_v24 = vmul.f32 0.5, %v183_v23 }
 0x174   :  { %186 = vrot.lane.b32.xlu0 %v184_v24, %s265_s3 }
 0x1e6   :  { %v187_v27 = vpop.permute.xlu0 %186 }
 0x1e7   :  { %v189_v28 = vadd.f32 %v187_v27, %v182_v26 }
 0x1e9   :  { %v208_v29 = vmul.f32 -1.442695, %v189_v28 }
 0x1eb   :  { %258 = vpow2.f32 %v208_v29 }
 0x1f5   :  { %v259_v30 = vpop.eup %258 }
 0x1f6   :  { %v193_v31 = vadd.f32 1.0, %v259_v30 }
 0x1f8   :  { %260 = vrcp.f32 %v193_v31 }
 0x202   :  { %v261_v32 = vpop.eup %260 }
 0x203   :  { %197 = vrot.lane.b32.xlu1 %v261_v32, %s266_s7 }
 0x275   :  { %v198_v33 = vpop.permute.xlu1 %197 }
 0x276   :  { %201 = vst.msk [vmem:[%s329_s4] sm:$0xff] %vm200_vm3, %v198_v33 }

</bundles_post_ra>
